<compile_context>
chip_gen: v6e
topology: v6e:2x2x1
jax: 0.10.0
libtpu: 0.0.40
codegen_flags: <defaults>
</compile_context>

<pallas_src>
import functools

import jax
import jax.numpy as jnp
from jax import lax
from jax.experimental import pallas as pl
from jax.experimental.pallas import tpu as pltpu


# Tile targets (multiples of 128; actual tiles shrink to fit small dims).
_TM, _TN, _TK = 512, 512, 512
_ATT_TQ = 256
_LN_EPS = 1e-12


def _vmem_limit_bytes():
    """~48 MiB on v7x (64 MiB physical / TC), ~96 MiB on v5e/v6e (128 MiB)."""
    cap = 64 * 1024 * 1024
    try:
        info = pltpu.get_tpu_info()
        cap = int(getattr(info, "vmem_capacity_bytes", cap))
    except Exception:
        pass
    return min(cap * 3 // 4, 100 * 1024 * 1024)


_VMEM_LIMIT = _vmem_limit_bytes()


def _round_up(n, m):
    return ((n + m - 1) // m) * m


def _tile(dim, target, align):
    """Largest tile <= target that divides `dim` and is a multiple of `align`;
    falls back to the full dim when no such divisor exists (weight dims only)."""
    if dim <= target:
        return dim
    t = (target // align) * align
    while t >= align:
        if dim % t == 0:
            return t
        t -= align
    return dim


def _row_tile_and_pad(m):
    """Tile + padded extent for the row (M = B*S) axis; never falls back to a
    huge un-tiled block — rows get zero-padded instead."""
    if m >= _TM:
        return _TM, _round_up(m, _TM)
    tm = _round_up(m, 8)
    return tm, tm


def _pad_rows(a, rows):
    if a.shape[0] == rows:
        return a
    return jnp.pad(a, ((0, rows - a.shape[0]), (0, 0)))


# -----------------------------------------------------------------------------
# Tiled dense: y = act(x @ w + b), bf16 MXU feeds, f32 accumulation.
# -----------------------------------------------------------------------------

def _dense_kernel(x_ref, w_ref, b_ref, o_ref, acc_ref, *, act):
    @pl.when(pl.program_id(2) == 0)
    def _():
        acc_ref[...] = jnp.zeros_like(acc_ref)

    acc_ref[...] += jnp.dot(x_ref[...].astype(jnp.bfloat16),
                            w_ref[...].astype(jnp.bfloat16),
                            preferred_element_type=jnp.float32)

    @pl.when(pl.program_id(2) == pl.num_programs(2) - 1)
    def _():
        y = acc_ref[...] + b_ref[...]
        if act == "gelu":
            y = 0.5 * y * (1.0 + jnp.tanh(0.7978845608028654
                                          * (y + 0.044715 * y * y * y)))
        elif act == "tanh":
            y = jnp.tanh(y)
        o_ref[...] = y


def dense(x, w, b, act="none"):
    """x: (M, K) f32, w: (K, N) bf16/f32, b: (N,) -> (M, N) f32."""
    M0, K = x.shape
    N = w.shape[1]
    tm, mp = _row_tile_and_pad(M0)
    tn = _tile(N, _TN, 128)
    tk = _tile(K, _TK, 128)
    xp = _pad_rows(x, mp)
    kernel = functools.partial(_dense_kernel, act=act)
    trans = mp * N if act in ("gelu", "tanh") else 0
    out = pl.pallas_call(
        kernel,
        out_shape=jax.ShapeDtypeStruct((mp, N), jnp.float32),
        grid=(mp // tm, N // tn, K // tk),
        in_specs=[
            pl.BlockSpec((tm, tk), lambda i, j, k: (i, k)),
            pl.BlockSpec((tk, tn), lambda i, j, k: (k, j)),
            pl.BlockSpec((1, tn), lambda i, j, k: (0, j)),
        ],
        out_specs=pl.BlockSpec((tm, tn), lambda i, j, k: (i, j)),
        scratch_shapes=[pltpu.VMEM((tm, tn), jnp.float32)],
        compiler_params=pltpu.CompilerParams(
            dimension_semantics=("parallel", "parallel", "arbitrary"),
            vmem_limit_bytes=_VMEM_LIMIT),
        cost_estimate=pl.CostEstimate(
            flops=2 * mp * N * K, transcendentals=trans,
            bytes_accessed=4 * mp * K + int(w.dtype.itemsize) * K * N + 4 * mp * N),
    )(xp, w, b.reshape(1, N))
    return out[:M0] if mp != M0 else out


# -----------------------------------------------------------------------------
# Tiled dense with fused residual + LayerNorm epilogue:
#   out = LayerNorm(res + x @ w + b).  N (= hidden) stays un-tiled for LN stats.
# -----------------------------------------------------------------------------

def _dense_res_ln_kernel(x_ref, w_ref, b_ref, r_ref, g_ref, bb_ref,
                         o_ref, acc_ref, *, eps):
    @pl.when(pl.program_id(1) == 0)
    def _():
        acc_ref[...] = jnp.zeros_like(acc_ref)

    acc_ref[...] += jnp.dot(x_ref[...].astype(jnp.bfloat16),
                            w_ref[...].astype(jnp.bfloat16),
                            preferred_element_type=jnp.float32)

    @pl.when(pl.program_id(1) == pl.num_programs(1) - 1)
    def _():
        y = acc_ref[...] + b_ref[...] + r_ref[...]
        mu = jnp.mean(y, axis=-1, keepdims=True)
        yc = y - mu
        var = jnp.mean(yc * yc, axis=-1, keepdims=True)
        o_ref[...] = yc * lax.rsqrt(var + eps) * g_ref[...] + bb_ref[...]


def dense_residual_layernorm(x, w, b, res, gamma, beta, eps=_LN_EPS):
    M0, K = x.shape
    N = w.shape[1]
    tm, mp = _row_tile_and_pad(M0)
    tk = _tile(K, _TK, 128)
    xp = _pad_rows(x, mp)
    rp = _pad_rows(res, mp)
    kernel = functools.partial(_dense_res_ln_kernel, eps=eps)
    out = pl.pallas_call(
        kernel,
        out_shape=jax.ShapeDtypeStruct((mp, N), jnp.float32),
        grid=(mp // tm, K // tk),
        in_specs=[
            pl.BlockSpec((tm, tk), lambda i, k: (i, k)),
            pl.BlockSpec((tk, N), lambda i, k: (k, 0)),
            pl.BlockSpec((1, N), lambda i, k: (0, 0)),
            pl.BlockSpec((tm, N), lambda i, k: (i, 0)),
            pl.BlockSpec((1, N), lambda i, k: (0, 0)),
            pl.BlockSpec((1, N), lambda i, k: (0, 0)),
        ],
        out_specs=pl.BlockSpec((tm, N), lambda i, k: (i, 0)),
        scratch_shapes=[pltpu.VMEM((tm, N), jnp.float32)],
        compiler_params=pltpu.CompilerParams(
            dimension_semantics=("parallel", "arbitrary"),
            vmem_limit_bytes=_VMEM_LIMIT),
        cost_estimate=pl.CostEstimate(
            flops=2 * mp * N * K + 8 * mp * N, transcendentals=mp,
            bytes_accessed=4 * mp * K + int(w.dtype.itemsize) * K * N + 12 * mp * N),
    )(xp, w, b.reshape(1, N), rp, gamma.reshape(1, N), beta.reshape(1, N))
    return out[:M0] if mp != M0 else out


# -----------------------------------------------------------------------------
# Standalone LayerNorm (embeddings only) — tiled over rows.
# -----------------------------------------------------------------------------

def _layernorm_kernel(x_ref, g_ref, b_ref, o_ref, *, eps):
    x = x_ref[...]
    mu = jnp.mean(x, axis=-1, keepdims=True)
    xc = x - mu
    var = jnp.mean(xc * xc, axis=-1, keepdims=True)
    o_ref[...] = xc * lax.rsqrt(var + eps) * g_ref[...] + b_ref[...]


def layernorm(x, gamma, beta, eps=_LN_EPS):
    M0, H = x.shape
    tm, mp = _row_tile_and_pad(M0)
    xp = _pad_rows(x, mp)
    kernel = functools.partial(_layernorm_kernel, eps=eps)
    out = pl.pallas_call(
        kernel,
        out_shape=jax.ShapeDtypeStruct((mp, H), jnp.float32),
        grid=(mp // tm,),
        in_specs=[
            pl.BlockSpec((tm, H), lambda i: (i, 0)),
            pl.BlockSpec((1, H), lambda i: (0, 0)),
            pl.BlockSpec((1, H), lambda i: (0, 0)),
        ],
        out_specs=pl.BlockSpec((tm, H), lambda i: (i, 0)),
        compiler_params=pltpu.CompilerParams(
            dimension_semantics=("parallel",),
            vmem_limit_bytes=_VMEM_LIMIT),
    )(xp, gamma.reshape(1, H), beta.reshape(1, H))
    return out[:M0] if mp != M0 else out


# -----------------------------------------------------------------------------
# Fused multi-head attention.
#   qkv : (B*S, 3H) fused Q|K|V projection output (stays in (rows, lanes) layout)
#   mask: (B, 1, S) additive mask, reused for every head (never replicated per head)
# Grid = (batch, S // tq): query-tile axis bounds the (tq, S) score tiles and gives
# megacore more parallel units.  Per-head slices are read straight from the refs;
# each head-pair's context is stored directly into o_ref (128-lane-wide for DH=64).
# -----------------------------------------------------------------------------

def _attention_kernel(q_ref, kv_ref, mask_ref, o_ref, *, heads, hidden, scale):
    S = kv_ref.shape[0]
    DH = hidden // heads
    mask = mask_ref[...].reshape(1, S)           # broadcast over query rows
    pair = 2 if heads % 2 == 0 else 1            # pair heads -> wider stores
    for h0 in range(0, heads, pair):
        ctxs = []
        for h in range(h0, h0 + pair):
            # scale folded into q; bf16 MXU feeds, f32 accumulation
            q = (q_ref[:, h * DH:(h + 1) * DH] * scale).astype(jnp.bfloat16)
            k = kv_ref[:, hidden + h * DH:hidden + (h + 1) * DH].astype(jnp.bfloat16)
            v = kv_ref[:, 2 * hidden + h * DH:2 * hidden + (h + 1) * DH].astype(jnp.bfloat16)
            s = lax.dot_general(q, k, (((1,), (1,)), ((), ())),
                                preferred_element_type=jnp.float32)   # (tq, S)
            s = s + mask
            s = s - jnp.max(s, axis=-1, keepdims=True)
            p = jnp.exp(s)
            p = p * pl.reciprocal(jnp.sum(p, axis=-1, keepdims=True), approx=True)
            ctxs.append(jnp.dot(p.astype(jnp.bfloat16), v,
                                preferred_element_type=jnp.float32))
        blk = jnp.concatenate(ctxs, axis=-1) if pair > 1 else ctxs[0]
        o_ref[:, h0 * DH:(h0 + pair) * DH] = blk  # direct per-pair store


def attention(qkv, mask, *, batch, seq, hidden, heads, scale):
    tq = _tile(seq, _ATT_TQ, 8)
    nq = seq // tq
    kernel = functools.partial(_attention_kernel, heads=heads, hidden=hidden,
                               scale=scale)
    return pl.pallas_call(
        kernel,
        out_shape=jax.ShapeDtypeStruct((batch * seq, hidden), jnp.float32),
        grid=(batch, nq),
        in_specs=[
            # query strip for this (batch, q-tile) step
            pl.BlockSpec((tq, 3 * hidden), lambda b, qi: (b * nq + qi, 0)),
            # full-sequence K/V strip for this batch (re-used across qi steps)
            pl.BlockSpec((seq, 3 * hidden), lambda b, qi: (b, 0)),
            pl.BlockSpec((1, 1, seq), lambda b, qi: (b, 0, 0)),
        ],
        out_specs=pl.BlockSpec((tq, hidden), lambda b, qi: (b * nq + qi, 0)),
        compiler_params=pltpu.CompilerParams(
            dimension_semantics=("parallel", "parallel"),
            vmem_limit_bytes=_VMEM_LIMIT),
        cost_estimate=pl.CostEstimate(
            flops=4 * batch * seq * seq * hidden,
            transcendentals=batch * heads * seq * seq,
            bytes_accessed=4 * (batch * seq * 4 * hidden + batch * seq)),
    )(qkv, qkv, mask)


# -----------------------------------------------------------------------------
# Fused pooler (tanh(Linear([CLS]))) + final fc head — tiny, one launch.
# -----------------------------------------------------------------------------

def _pooler_fc_kernel(cls_ref, pw_ref, pb_ref, fw_ref, fb_ref, o_ref):
    pooled = jnp.tanh(jnp.dot(cls_ref[...].astype(jnp.bfloat16),
                              pw_ref[...].astype(jnp.bfloat16),
                              preferred_element_type=jnp.float32) + pb_ref[...])
    o_ref[...] = jnp.dot(pooled.astype(jnp.bfloat16),
                         fw_ref[...].astype(jnp.bfloat16),
                         preferred_element_type=jnp.float32) + fb_ref[...]


def pooler_fc(cls, pw, pb, fw, fb):
    B, H = cls.shape
    E = fw.shape[1]
    return pl.pallas_call(
        _pooler_fc_kernel,
        out_shape=jax.ShapeDtypeStruct((B, E), jnp.float32),
        in_specs=[pl.BlockSpec(memory_space=pltpu.MemorySpace.VMEM)] * 5,
        out_specs=pl.BlockSpec(memory_space=pltpu.MemorySpace.VMEM),
    )(cls, pw, pb.reshape(1, H), fw, fb.reshape(1, E))


# -----------------------------------------------------------------------------
# Synthetic BERT parameters (QKV weights pre-fused into one (H, 3H) matrix).
# Matmul weights stored bf16 (halves weight DMA, feeds MXU at bf16 rate);
# biases / LayerNorm params / embedding tables stay f32.
# -----------------------------------------------------------------------------

def init_params(key, *, vocab, hidden, layers, heads, inter, max_pos,
                type_vocab, emb_size):
    ks = iter(jax.random.split(key, 128))

    def nrm(shape, std=0.02, dtype=jnp.float32):
        return (std * jax.random.normal(next(ks), shape)).astype(dtype)

    def wmat(shape):
        return nrm(shape, dtype=jnp.bfloat16)

    p = {
        "word_emb": nrm((vocab, hidden)),
        "pos_emb": nrm((max_pos, hidden)),
        "type_emb": nrm((type_vocab, hidden)),
        "emb_ln_g": jnp.ones((hidden,), jnp.float32),
        "emb_ln_b": jnp.zeros((hidden,), jnp.float32),
        "layers": [],
        "pooler_w": wmat((hidden, hidden)),
        "pooler_b": jnp.zeros((hidden,), jnp.float32),
        "fc_w": wmat((hidden, emb_size)),
        "fc_b": jnp.zeros((emb_size,), jnp.float32),
    }
    for _ in range(layers):
        wq, wk, wv = wmat((hidden, hidden)), wmat((hidden, hidden)), wmat((hidden, hidden))
        p["layers"].append({
            "wqkv": jnp.concatenate([wq, wk, wv], axis=1),           # (H, 3H) bf16
            "bqkv": jnp.zeros((3 * hidden,), jnp.float32),
            "wo": wmat((hidden, hidden)), "bo": jnp.zeros((hidden,), jnp.float32),
            "ln1_g": jnp.ones((hidden,), jnp.float32),
            "ln1_b": jnp.zeros((hidden,), jnp.float32),
            "w1": wmat((hidden, inter)), "b1": jnp.zeros((inter,), jnp.float32),
            "w2": wmat((inter, hidden)), "b2": jnp.zeros((hidden,), jnp.float32),
            "ln2_g": jnp.ones((hidden,), jnp.float32),
            "ln2_b": jnp.zeros((hidden,), jnp.float32),
        })
    return p


# -----------------------------------------------------------------------------
# Forward pass (matches Bert.forward: pooled output -> fc projection)
# -----------------------------------------------------------------------------

def bert_forward(params, input_ids, token_type_ids, attention_mask, *, heads):
    B, S = input_ids.shape
    H = params["word_emb"].shape[1]
    DH = H // heads
    scale = 1.0 / float(DH) ** 0.5

    # ---- embeddings (gathers are XLA glue; LayerNorm runs in-kernel) ----
    pos_ids = jnp.arange(S, dtype=jnp.int32)
    emb = (jnp.take(params["word_emb"], input_ids, axis=0)
           + jnp.take(params["pos_emb"], pos_ids, axis=0)[None, :, :]
           + jnp.take(params["type_emb"], token_type_ids, axis=0))
    h = layernorm(emb.reshape(B * S, H), params["emb_ln_g"], params["emb_ln_b"])

    # additive attention mask kept at (B, 1, S); reused by every head in-kernel
    ext_mask = ((1.0 - attention_mask.astype(jnp.float32)) * -10000.0)[:, None, :]

    # ---- encoder layers ----
    for lp in params["layers"]:
        qkv = dense(h, lp["wqkv"], lp["bqkv"])                       # fused Q|K|V
        ctx = attention(qkv, ext_mask, batch=B, seq=S, hidden=H,
                        heads=heads, scale=scale)
        h = dense_residual_layernorm(ctx, lp["wo"], lp["bo"], h,
                                     lp["ln1_g"], lp["ln1_b"])
        ff = dense(h, lp["w1"], lp["b1"], act="gelu")
        h = dense_residual_layernorm(ff, lp["w2"], lp["b2"], h,
                                     lp["ln2_g"], lp["ln2_b"])

    # ---- pooler (bert_output[1]) + final fc, fused ----
    cls = h.reshape(B, S, H)[:, 0, :]                                # (B, H)
    return pooler_fc(cls, params["pooler_w"], params["pooler_b"],
                     params["fc_w"], params["fc_b"])                 # (B, E)


# -----------------------------------------------------------------------------
# main
# -----------------------------------------------------------------------------

if __name__ == "__main__":
    # small synthetic config (stand-in for bert-base-chinese)
    B, S = 2, 8
    VOCAB, HIDDEN, LAYERS, HEADS, INTER = 128, 32, 2, 4, 64
    MAX_POS, TYPE_VOCAB, EMB_SIZE = 16, 2, 16

    key = jax.random.PRNGKey(0)
    pkey, ikey, tkey = jax.random.split(key, 3)

    params = init_params(pkey, vocab=VOCAB, hidden=HIDDEN, layers=LAYERS,
                         heads=HEADS, inter=INTER, max_pos=MAX_POS,
                         type_vocab=TYPE_VOCAB, emb_size=EMB_SIZE)

    bert_input = {
        "input_ids": jax.random.randint(ikey, (B, S), 0, VOCAB, dtype=jnp.int32),
        "token_type_ids": jax.random.randint(tkey, (B, S), 0, TYPE_VOCAB,
                                             dtype=jnp.int32),
        "attention_mask": jnp.ones((B, S), dtype=jnp.int32),
    }

    out = bert_forward(params,
                       bert_input["input_ids"],
                       bert_input["token_type_ids"],
                       bert_input["attention_mask"],
                       heads=HEADS)
    out = jax.block_until_ready(out)
    assert out.shape == (B, EMB_SIZE) and out.dtype == jnp.float32
    print("KERNEL_OK")
</pallas_src>

<mosaic_0001>
module attributes {stable_mosaic.version = 11 : i64} {
  func.func @_layernorm_kernel(%arg0: i32, %arg1: memref<16x32xf32, #tpu.memory_space<vmem>>, %arg2: memref<1x32xf32, #tpu.memory_space<vmem>>, %arg3: memref<1x32xf32, #tpu.memory_space<vmem>>, %arg4: memref<16x32xf32, #tpu.memory_space<vmem>>) attributes {dimension_semantics = [#tpu.dimension_semantics<parallel>], iteration_bounds = array<i64: 1>, scalar_prefetch = 0 : i64, scratch_operands = 0 : i64, tpu.core_type = #tpu.core_type<tc>, window_params = [{transform_indices = @transform_0, window_bounds = array<i64: 16, 32>}, {pipeline_mode = #tpu.pipeline_mode<synchronous>, transform_indices = @transform_1, window_bounds = array<i64: 1, 32>}, {pipeline_mode = #tpu.pipeline_mode<synchronous>, transform_indices = @transform_2, window_bounds = array<i64: 1, 32>}, {transform_indices = @transform_3, window_bounds = array<i64: 16, 32>}]} {
    %c0 = arith.constant 0 : index
    %c0_0 = arith.constant 0 : index
    %0 = vector.load %arg1[%c0, %c0_0] : memref<16x32xf32, #tpu.memory_space<vmem>>, vector<16x32xf32>
    %cst = arith.constant dense<0.000000e+00> : vector<16xf32>
    %1 = vector.multi_reduction <add>, %0, %cst [1] : vector<16x32xf32> to vector<16xf32>
    %2 = vector.shape_cast %1 : vector<16xf32> to vector<16x1xf32>
    %cst_1 = arith.constant 3.200000e+01 : f32
    %3 = vector.broadcast %cst_1 : f32 to vector<16x1xf32>
    %4 = arith.divf %2, %3 : vector<16x1xf32>
    %5 = vector.broadcast %4 : vector<16x1xf32> to vector<16x32xf32>
    %6 = arith.subf %0, %5 : vector<16x32xf32>
    %7 = arith.mulf %6, %6 : vector<16x32xf32>
    %cst_2 = arith.constant dense<0.000000e+00> : vector<16xf32>
    %8 = vector.multi_reduction <add>, %7, %cst_2 [1] : vector<16x32xf32> to vector<16xf32>
    %9 = vector.shape_cast %8 : vector<16xf32> to vector<16x1xf32>
    %cst_3 = arith.constant 3.200000e+01 : f32
    %10 = vector.broadcast %cst_3 : f32 to vector<16x1xf32>
    %11 = arith.divf %9, %10 : vector<16x1xf32>
    %cst_4 = arith.constant 9.99999996E-13 : f32
    %12 = vector.broadcast %cst_4 : f32 to vector<16x1xf32>
    %13 = arith.addf %11, %12 : vector<16x1xf32>
    %14 = math.rsqrt %13 : vector<16x1xf32>
    %15 = vector.broadcast %14 : vector<16x1xf32> to vector<16x32xf32>
    %16 = arith.mulf %6, %15 : vector<16x32xf32>
    %c0_5 = arith.constant 0 : index
    %c0_6 = arith.constant 0 : index
    %17 = vector.load %arg2[%c0_5, %c0_6] : memref<1x32xf32, #tpu.memory_space<vmem>>, vector<1x32xf32>
    %18 = vector.broadcast %17 : vector<1x32xf32> to vector<16x32xf32>
    %19 = arith.mulf %16, %18 : vector<16x32xf32>
    %c0_7 = arith.constant 0 : index
    %c0_8 = arith.constant 0 : index
    %20 = vector.load %arg3[%c0_7, %c0_8] : memref<1x32xf32, #tpu.memory_space<vmem>>, vector<1x32xf32>
    %21 = vector.broadcast %20 : vector<1x32xf32> to vector<16x32xf32>
    %22 = arith.addf %19, %21 : vector<16x32xf32>
    %c0_9 = arith.constant 0 : index
    %c0_10 = arith.constant 0 : index
    %23 = vector.load %arg4[%c0_9, %c0_10] : memref<16x32xf32, #tpu.memory_space<vmem>>, vector<16x32xf32>
    tpu.vector_store %arg4[%c0_9, %c0_10], %22 {strides = array<i32>} : memref<16x32xf32, #tpu.memory_space<vmem>>, vector<16x32xf32>,
    return
  }
  func.func @transform_0(%arg0: i32) -> (i32, i32) {
    %c0_i32 = arith.constant 0 : i32
    %c0_i32_0 = arith.constant 0 : i32
    return %arg0, %c0_i32 : i32, i32
  }
  func.func @transform_1(%arg0: i32) -> (i32, i32) {
    %c0_i32 = arith.constant 0 : i32
    %c0_i32_0 = arith.constant 0 : i32
    %c0_i32_1 = arith.constant 0 : i32
    return %c0_i32, %c0_i32_0 : i32, i32
  }
  func.func @transform_2(%arg0: i32) -> (i32, i32) {
    %c0_i32 = arith.constant 0 : i32
    %c0_i32_0 = arith.constant 0 : i32
    %c0_i32_1 = arith.constant 0 : i32
    return %c0_i32, %c0_i32_0 : i32, i32
  }
  func.func @transform_3(%arg0: i32) -> (i32, i32) {
    %c0_i32 = arith.constant 0 : i32
    %c0_i32_0 = arith.constant 0 : i32
    return %arg0, %c0_i32 : i32, i32
  }
}

</mosaic_0001>

<bundles_post_ra>
// kernel: tpu_custom_call.1
= control target key start
LH: loop header
LB: loop body
LE: loop exit
PB: predicated region body
PF: predicated region fallthrough
CT: control target
= control target key end

     0   :  { %8 = vsyncpa [#allocation3], 0  ;;  %s198_s0 = inlined_call_operand.hbm [shape: f32[16,32], index: 0, kind: input, shape index: {}]   ;;  %s199_s1 = inlined_call_operand.vmem [shape: f32[1,32], index: 1, kind: input, shape index: {}]   ;;  %s200_s2 = inlined_call_operand.vmem [shape: f32[1,32], index: 2, kind: input, shape index: {}]   ;;  %s201_s3 = inlined_call_operand.hbm [shape: f32[16,32], index: 3, kind: output, shape index: {}]  }
   0x1   :  { %9 = vsyncpa [#allocation4], 0  ;;  %s150_s12 = smov [#allocation2]  }
   0x2   :  { %s15_s13 = sshll.u32 %s150_s12, 4  ;;  %s16_s13 = int_to_ptr.vmem [resolvable:$true] %s15_s13 }
   0x3   :  { %s114_s14 = scalar_lea.vmem %s16_s13, 256  ;;  %p119_p1 = scmp.lt.s32.totalorder %s16_s13, %s16_s13 }
   0x4   :  { %p115_p0 = scmp.ne.s32.totalorder %s16_s13, %s114_s14  ;;  %p120_p2 = scmp.lt.s32.totalorder %s114_s14, %s114_s14 }
   0x6   :  { %p121_p3 = por %p120_p2, %p119_p1 }
   0x8   :  { %p122_p4 = pnand %p121_p3, %p115_p0 }
   0xa   :  { %125 = shalt.err (!%p122_p4)
}
   0xb   :  { %s151_s15 = smov 128   ;;  %s152_s16 = smov 8  }
   0xc   :  { %21 = dma.hbm_to_vmem [thread:$0]  %s198_s0, 256, %s16_s13, [#allocation3], %s151_s15, %s151_s15, %s152_s16  }
   0xd   :  { %146 = dma.done.wait [#allocation3], 256  }
   0xe   :  { %147 = vsyncadd [#allocation3], 4294967040  ;;  %vm31_vm0 = vcmask 261120   ;;  %v29_v0 = vld [vmem:[#allocation2] sm:$0xff]  ;;  %v30_v1 = vld [vmem:[#allocation2 + $0x8] sm:$0xff]  ;;  %s153_s22 = smov [#allocation5]  }
   0xf   :  { %v32_v2 = vsel %vm31_vm0, %v29_v0, 0.0  ;;  %v35_v3 = vsel %vm31_vm0, %v30_v1, 0.0  ;;  %v96_v21 = vld [vmem:[%s199_s1] ss:$0 sm:$0xff]  ;;  %s84_s23 = sshll.u32 %s153_s22, 4  ;;  %s85_s23 = int_to_ptr.vmem [resolvable:$true] %s84_s23 }
  0x10   :  { %33 = vadd.xlane.f32.xlu0 %v32_v2  ;;  %v97_v23 = vld [vmem:[%s200_s2] ss:$0 sm:$0xff]  ;;  %s126_s24 = scalar_lea.vmem %s85_s23, 256  ;;  %p131_p6 = scmp.lt.s32.totalorder %s85_s23, %s85_s23 }
  0x11   :  { %p127_p5 = scmp.ne.s32.totalorder %s85_s23, %s126_s24  ;;  %p132_p7 = scmp.lt.s32.totalorder %s126_s24, %s126_s24 }
  0x13   :  { %p133_p8 = por %p132_p7, %p131_p6 }
  0x14   :  { %36 = vadd.xlane.f32.xlu0 %v35_v3 }
  0x15   :  { %p134_p9 = pnand %p133_p8, %p127_p5 }
  0x99   :  { %v34_v4 = vpop.xlane.xlu0 %33 }
  0x9a   :  { %v39_v5 = vmul.f32 0.03125, %v34_v4 }
  0x9c   :  { %v41_v6 = vsub.f32 %v29_v0, %v39_v5 }
  0x9d   :  { %v37_v7 = vpop.xlane.xlu0 %36 }
  0x9e   :  { %v40_v8 = vmul.f32 0.03125, %v37_v7  ;;  %v43_v9 = vmul.f32 %v41_v6, %v41_v6 }
  0xa0   :  { %v42_v10 = vsub.f32 %v30_v1, %v40_v8  ;;  %v45_v11 = vsel %vm31_vm0, %v43_v9, 0.0 }
  0xa1   :  { %46 = vadd.xlane.f32.xlu1 %v45_v11 }
  0xa2   :  { %v44_v12 = vmul.f32 %v42_v10, %v42_v10 }
  0xa4   :  { %v48_v13 = vsel %vm31_vm0, %v44_v12, 0.0 }
  0xa5   :  { %49 = vadd.xlane.f32.xlu1 %v48_v13 }
 0x12a   :  { %v47_v14 = vpop.xlane.xlu1 %46 }
 0x12b   :  { %v51_v15 = vmul.f32 0.03125, %v47_v14 }
 0x12d   :  { %v53_v16 = vadd.f32 1e-12, %v51_v15 }
 0x12e   :  { %v50_v17 = vpop.xlane.xlu1 %49 }
 0x12f   :  { %102 = vrsqrt.f32 %v53_v16  ;;  %v52_v18 = vmul.f32 0.03125, %v50_v17 }
 0x131   :  { %v54_v19 = vadd.f32 1e-12, %v52_v18 }
 0x133   :  { %104 = vrsqrt.f32 %v54_v19 }
 0x13c   :  { %v103_v20 = vpop.eup %102 }
 0x13d   :  { %v57_v22 = vmul.f32 %v103_v20, %v41_v6 }
 0x13f   :  { %v66_v24 = vmul.f32 %v96_v21, %v57_v22 }
 0x140   :  { %v105_v25 = vpop.eup %104 }
 0x141   :  { %v58_v26 = vmul.f32 %v105_v25, %v42_v10  ;;  %v75_v27 = vadd.f32 %v97_v23, %v66_v24 }
 0x143   :  { %v67_v28 = vmul.f32 %v96_v21, %v58_v26  ;;  %77 = vst.msk [vmem:[#allocation5] sm:$0xff] %vm31_vm0, %v75_v27 }
 0x145   :  { %v76_v29 = vadd.f32 %v97_v23, %v67_v28 }
 0x147   :  { %78 = vst.msk [vmem:[#allocation5 + $0x8] sm:$0xff] %vm31_vm0, %v76_v29 }
 0x148   :  { %137 = shalt.err (!%p134_p9)
}
 0x149   :  { %90 = dma.vmem_to_hbm [thread:$0]  %s85_s23, 256, %s201_s3, [#allocation4], %s151_s15, %s151_s15, %s152_s16  }
 0x14a   :  { %148 = dma.done.wait [#allocation4], 256  }
 0x14b   :  { %149 = vsyncadd [#allocation4], 4294967040 }
 0x14c   :  { %94 = vsyncpa [#allocation3], 1 }
 0x14d   :  { %95 = vsyncpa [#allocation4], 1 }

</bundles_post_ra>
